<compile_context>
chip_gen: v5e
topology: v5e:2x2
jax: 0.10.0
libtpu: 0.0.40
codegen_flags: <defaults>
</compile_context>

<pallas_src>
import jax
import jax.numpy as jnp
from jax.experimental import pallas as pl
from jax.experimental.pallas import tpu as pltpu


# ----------------------------------------------------------------------------
# Kernel
# ----------------------------------------------------------------------------
def make_split_mlp_kernel(relu_modes):
    """Fused kernel over the packed layer stack (feature-major layout).

    Ref order:
      x_ref (F_total, tile_b),
      for each layer: Wt (d_out, d_in), b (d_out, 1), [mask (d_out, 1) if mixed],
      out_ref (out_dim, tile_b).
    relu_modes[j] in {"all", "none", "mask"}.
    """
    n_layers = len(relu_modes)

    def kernel(*refs):
        idx = 0
        a = refs[idx][...]                       # (F_total, tile_b), compute dtype
        idx += 1
        for j in range(n_layers):
            w = refs[idx][...]; idx += 1         # (d_out, d_in), compute dtype
            b = refs[idx][...]; idx += 1         # (d_out, 1), f32
            # MXU matmul, f32 accumulation; bias/ReLU stay f32 on the VPU.
            h = jnp.dot(w, a.astype(w.dtype),
                        preferred_element_type=jnp.float32) + b
            mode = relu_modes[j]
            if mode == "all":
                h = jnp.maximum(h, 0.0)
            elif mode == "mask":
                m = refs[idx][...]; idx += 1     # (d_out, 1) f32 0/1
                h = jnp.where(m > 0.0, jnp.maximum(h, 0.0), h)
            a = h
        out_ref = refs[idx]
        # out_activation = Sigmoid (EUP), lane-dense store (batch on lanes).
        out_ref[...] = jax.nn.sigmoid(a).astype(out_ref.dtype)

    return kernel


# ----------------------------------------------------------------------------
# Wrapper helpers
# ----------------------------------------------------------------------------
def _round_up(x, m):
    return (x + m - 1) // m * m


def _block_diag(blocks):
    rows = sum(int(b.shape[0]) for b in blocks)
    cols = sum(int(b.shape[1]) for b in blocks)
    out = jnp.zeros((rows, cols), jnp.float32)
    r = c = 0
    for b in blocks:
        out = out.at[r:r + b.shape[0], c:c + b.shape[1]].set(b.astype(jnp.float32))
        r += int(b.shape[0])
        c += int(b.shape[1])
    return out


def _pack_local_layers(Xs, local_params):
    """Pack all parties' local MLPs into block-diagonal layers (one per depth).

    Shallower parties get an identity pass-through (no bias, no ReLU), so the
    packed output columns equal concat(local_outputs) exactly.
    """
    n_parties = len(Xs)
    depths = [len(lp) for lp in local_params]
    max_depth = max(depths)
    cur_dims = [int(x.shape[1]) for x in Xs]
    packed = []
    for j in range(max_depth):
        blocks, biases, relu_flags, out_dims = [], [], [], []
        for p in range(n_parties):
            if j < depths[p]:
                w, b = local_params[p][j]
                blocks.append(w)
                biases.append(b.astype(jnp.float32))
                relu_flags.append(j < depths[p] - 1)     # ReLU except last layer
                out_dims.append(int(w.shape[1]))
            else:                                        # identity pass-through
                d = cur_dims[p]
                blocks.append(jnp.eye(d, dtype=jnp.float32))
                biases.append(jnp.zeros((d,), jnp.float32))
                relu_flags.append(False)
                out_dims.append(d)
        packed.append((_block_diag(blocks), jnp.concatenate(biases),
                       relu_flags, out_dims))
        cur_dims = out_dims
    return packed, sum(cur_dims)


# ----------------------------------------------------------------------------
# Wrapper
# ----------------------------------------------------------------------------
def split_mlp_forward(Xs, local_params, agg_params, *, tile_b=None,
                      compute_dtype=jnp.float32):
    """Xs: list of (B, f_p) arrays.  local_params[p] = list of (W(in,out), b).
    agg_params = list of (W(in,out), b).  Returns (B, out_dim) float32.

    compute_dtype=jnp.bfloat16 casts matmul operands (X and weights) to bf16 for
    the v6e/v7x MXU; accumulation/bias/activations remain float32.
    """
    n_parties = len(Xs)
    B = int(Xs[0].shape[0])
    out_dim = int(agg_params[-1][0].shape[1])

    # ---- batch tile selection (lane-dense, multiple of 128) ----
    b_pad128 = _round_up(B, 128)
    if tile_b is None:
        tile_b = min(512, b_pad128)
        # v7x megacore: prefer >=2 grid steps so "parallel" shards across 2 TCs.
        if b_pad128 // tile_b < 2 and b_pad128 >= 256:
            tile_b = max(128, (b_pad128 // 2) // 128 * 128)
    assert tile_b % 128 == 0, "tile_b must be a multiple of 128"
    B_pad = _round_up(B, tile_b)
    num_tiles = B_pad // tile_b

    # ---- pack local MLPs into block-diagonal layers; append agg layers ----
    packed_local, cut_dim = _pack_local_layers(Xs, local_params)
    assert cut_dim == int(agg_params[0][0].shape[0]), "agg input dim mismatch"

    layer_specs = []  # (Wt, b_col, mode, mask_or_None)
    for W, b, flags, out_dims in packed_local:
        if all(flags):
            mode, mask = "all", None
        elif not any(flags):
            mode, mask = "none", None
        else:
            mode = "mask"
            mask = jnp.concatenate(
                [jnp.full((d,), 1.0 if f else 0.0, jnp.float32)
                 for d, f in zip(out_dims, flags)]).reshape(-1, 1)
        layer_specs.append((W.T.astype(compute_dtype),
                            b.reshape(-1, 1).astype(jnp.float32), mode, mask))
    n_agg = len(agg_params)
    for i, (w, b) in enumerate(agg_params):
        mode = "all" if i < n_agg - 1 else "none"
        layer_specs.append((jnp.asarray(w, jnp.float32).T.astype(compute_dtype),
                            jnp.asarray(b, jnp.float32).reshape(-1, 1),
                            mode, None))

    # ---- inputs: concat parties, transpose to feature-major, pad batch ----
    x_cat = jnp.concatenate([jnp.asarray(x, jnp.float32) for x in Xs], axis=1)
    F_total = int(x_cat.shape[1])
    x_t = x_cat.T.astype(compute_dtype)                    # (F_total, B)
    x_t = jnp.pad(x_t, ((0, 0), (0, B_pad - B)))           # zero-pad batch

    # ---- flatten args + BlockSpecs ----
    flat = [x_t]
    in_specs = [pl.BlockSpec((F_total, tile_b), lambda m: (0, m))]

    def add_param(arr):
        flat.append(arr)
        in_specs.append(pl.BlockSpec(arr.shape, lambda m: (0, 0)))

    relu_modes = []
    for (wt, bcol, mode, mask) in layer_specs:
        add_param(wt)
        add_param(bcol)
        if mode == "mask":
            add_param(mask)
        relu_modes.append(mode)

    kernel = make_split_mlp_kernel(tuple(relu_modes))

    # ---- advisory cost estimate ----
    param_bytes = sum(int(a.size) * a.dtype.itemsize for a in flat[1:])
    flops = 2 * B_pad * sum(int(wt.shape[0]) * int(wt.shape[1])
                            for wt, _, _, _ in layer_specs)
    bytes_accessed = (int(x_t.size) * x_t.dtype.itemsize
                      + out_dim * B_pad * 4
                      + num_tiles * param_bytes)
    cost = pl.CostEstimate(flops=int(flops),
                           transcendentals=int(B_pad * out_dim),
                           bytes_accessed=int(bytes_accessed))

    out_t = pl.pallas_call(
        kernel,
        out_shape=jax.ShapeDtypeStruct((out_dim, B_pad), jnp.float32),
        grid=(num_tiles,),
        in_specs=in_specs,
        out_specs=pl.BlockSpec((out_dim, tile_b), lambda m: (0, m)),
        compiler_params=pltpu.CompilerParams(dimension_semantics=("parallel",)),
        cost_estimate=cost,
    )(*flat)

    return out_t[:, :B].T                                   # (B, out_dim) f32


# ----------------------------------------------------------------------------
# Pure-JAX reference (mirrors the PyTorch module exactly, incl. the concat)
# ----------------------------------------------------------------------------
def split_mlp_reference(Xs, local_params, agg_params):
    def mlp(x, layers):
        for j, (w, b) in enumerate(layers):
            x = x @ w + b
            if j != len(layers) - 1:
                x = jnp.maximum(x, 0.0)
        return x

    local_outs = [mlp(x, lp) for x, lp in zip(Xs, local_params)]
    agg_in = jnp.concatenate(local_outs, axis=1)
    agg_out = mlp(agg_in, agg_params)
    return jax.nn.sigmoid(agg_out)


# ----------------------------------------------------------------------------
# Main
# ----------------------------------------------------------------------------
if __name__ == "__main__":
    key = jax.random.PRNGKey(0)

    # Architecture (matches SplitMLP docstring style):
    #   2 parties; party 0: 8 features -> [16]; party 1: 12 features -> [16, 24]
    #   agg MLP: concat(16+24=40) -> [32, 1]; output activation = Sigmoid
    B = 16
    local_input_channels = [8, 12]
    local_hidden_channels = [[16], [16, 24]]
    agg_hidden_channels = [32, 1]

    def init_linear(k, fan_in, fan_out):
        kw, kb = jax.random.split(k)
        scale = 1.0 / jnp.sqrt(jnp.float32(fan_in))
        w = jax.random.uniform(kw, (fan_in, fan_out), jnp.float32, -scale, scale)
        b = jax.random.uniform(kb, (fan_out,), jnp.float32, -scale, scale)
        return w, b

    keys = iter(jax.random.split(key, 64))
    local_params = []
    for p, hidden in enumerate(local_hidden_channels):
        dims = [local_input_channels[p]] + hidden
        local_params.append(
            [init_linear(next(keys), dims[j], dims[j + 1]) for j in range(len(hidden))]
        )
    cut_dim = sum(h[-1] for h in local_hidden_channels)
    agg_dims = [cut_dim] + agg_hidden_channels
    agg_params = [init_linear(next(keys), agg_dims[j], agg_dims[j + 1])
                  for j in range(len(agg_hidden_channels))]

    kx0, kx1 = jax.random.split(jax.random.PRNGKey(1))
    Xs = [jax.random.normal(kx0, (B, local_input_channels[0]), jnp.float32),
          jax.random.normal(kx1, (B, local_input_channels[1]), jnp.float32)]

    ref = split_mlp_reference(Xs, local_params, agg_params)

    # f32 path (default): exact-equivalence check.
    out = split_mlp_forward(Xs, local_params, agg_params)
    out = jax.block_until_ready(out)
    assert out.shape == (B, agg_hidden_channels[-1]), out.shape
    assert jnp.allclose(out, ref, rtol=1e-5, atol=1e-5), (
        f"f32 max abs err {jnp.max(jnp.abs(out - ref))}")

    # bf16 MXU-operand path (v6e/v7x recipe): looser tolerance.
    out_bf16 = split_mlp_forward(Xs, local_params, agg_params,
                                 compute_dtype=jnp.bfloat16)
    out_bf16 = jax.block_until_ready(out_bf16)
    assert jnp.allclose(out_bf16, ref, rtol=5e-2, atol=5e-2), (
        f"bf16 max abs err {jnp.max(jnp.abs(out_bf16 - ref))}")

    print("KERNEL_OK")
</pallas_src>

<mosaic_0001>
module attributes {stable_mosaic.version = 11 : i64} {
  func.func @kernel(%arg0: i32, %arg1: memref<20x128xf32, #tpu.memory_space<vmem>>, %arg2: memref<32x20xf32, #tpu.memory_space<vmem>>, %arg3: memref<32x1xf32, #tpu.memory_space<vmem>>, %arg4: memref<32x1xf32, #tpu.memory_space<vmem>>, %arg5: memref<40x32xf32, #tpu.memory_space<vmem>>, %arg6: memref<40x1xf32, #tpu.memory_space<vmem>>, %arg7: memref<32x40xf32, #tpu.memory_space<vmem>>, %arg8: memref<32x1xf32, #tpu.memory_space<vmem>>, %arg9: memref<1x32xf32, #tpu.memory_space<vmem>>, %arg10: memref<1x1xf32, #tpu.memory_space<vmem>>, %arg11: memref<1x128xf32, #tpu.memory_space<vmem>>) attributes {dimension_semantics = [#tpu.dimension_semantics<parallel>], iteration_bounds = array<i64: 1>, scalar_prefetch = 0 : i64, scratch_operands = 0 : i64, tpu.core_type = #tpu.core_type<tc>, window_params = [{transform_indices = @transform_0, window_bounds = array<i64: 20, 128>}, {pipeline_mode = #tpu.pipeline_mode<synchronous>, transform_indices = @transform_1, window_bounds = array<i64: 32, 20>}, {pipeline_mode = #tpu.pipeline_mode<synchronous>, transform_indices = @transform_2, window_bounds = array<i64: 32, 1>}, {pipeline_mode = #tpu.pipeline_mode<synchronous>, transform_indices = @transform_3, window_bounds = array<i64: 32, 1>}, {pipeline_mode = #tpu.pipeline_mode<synchronous>, transform_indices = @transform_4, window_bounds = array<i64: 40, 32>}, {pipeline_mode = #tpu.pipeline_mode<synchronous>, transform_indices = @transform_5, window_bounds = array<i64: 40, 1>}, {pipeline_mode = #tpu.pipeline_mode<synchronous>, transform_indices = @transform_6, window_bounds = array<i64: 32, 40>}, {pipeline_mode = #tpu.pipeline_mode<synchronous>, transform_indices = @transform_7, window_bounds = array<i64: 32, 1>}, {pipeline_mode = #tpu.pipeline_mode<synchronous>, transform_indices = @transform_8, window_bounds = array<i64: 1, 32>}, {pipeline_mode = #tpu.pipeline_mode<synchronous>, transform_indices = @transform_9, window_bounds = array<i64: 1, 1>}, {transform_indices = @transform_10, window_bounds = array<i64: 1, 128>}]} {
    %c0 = arith.constant 0 : index
    %c0_0 = arith.constant 0 : index
    %0 = vector.load %arg1[%c0, %c0_0] : memref<20x128xf32, #tpu.memory_space<vmem>>, vector<20x128xf32>
    %c0_1 = arith.constant 0 : index
    %c0_2 = arith.constant 0 : index
    %1 = vector.load %arg2[%c0_1, %c0_2] : memref<32x20xf32, #tpu.memory_space<vmem>>, vector<32x20xf32>
    %c0_3 = arith.constant 0 : index
    %c0_4 = arith.constant 0 : index
    %2 = vector.load %arg3[%c0_3, %c0_4] : memref<32x1xf32, #tpu.memory_space<vmem>>, vector<32x1xf32>
    %cst = arith.constant dense<0.000000e+00> : vector<32x128xf32>
    %3 = tpu.matmul %1, %0, %cst {dimension_numbers = #tpu.dot_dimension_numbers<[1], [0], [0], [1], [0, 0, 1, 1], [], []>} : vector<32x20xf32>, vector<20x128xf32>, vector<32x128xf32> -> vector<32x128xf32>
    %4 = vector.broadcast %2 : vector<32x1xf32> to vector<32x128xf32>
    %5 = arith.addf %3, %4 : vector<32x128xf32>
    %c0_5 = arith.constant 0 : index
    %c0_6 = arith.constant 0 : index
    %6 = vector.load %arg4[%c0_5, %c0_6] : memref<32x1xf32, #tpu.memory_space<vmem>>, vector<32x1xf32>
    %cst_7 = arith.constant 0.000000e+00 : f32
    %7 = vector.broadcast %cst_7 : f32 to vector<32x1xf32>
    %8 = arith.cmpf ogt, %6, %7 : vector<32x1xf32>
    %cst_8 = arith.constant 0.000000e+00 : f32
    %9 = vector.broadcast %cst_8 : f32 to vector<32x128xf32>
    %10 = arith.maximumf %5, %9 : vector<32x128xf32>
    %11 = vector.shape_cast %8 : vector<32x1xi1> to vector<32x1xi1>
    %12 = vector.broadcast %11 : vector<32x1xi1> to vector<32x128xi1>
    %13 = arith.select %12, %10, %5 : vector<32x128xi1>, vector<32x128xf32>
    %c0_9 = arith.constant 0 : index
    %c0_10 = arith.constant 0 : index
    %14 = vector.load %arg5[%c0_9, %c0_10] : memref<40x32xf32, #tpu.memory_space<vmem>>, vector<40x32xf32>
    %c0_11 = arith.constant 0 : index
    %c0_12 = arith.constant 0 : index
    %15 = vector.load %arg6[%c0_11, %c0_12] : memref<40x1xf32, #tpu.memory_space<vmem>>, vector<40x1xf32>
    %cst_13 = arith.constant dense<0.000000e+00> : vector<40x128xf32>
    %16 = tpu.matmul %14, %13, %cst_13 {dimension_numbers = #tpu.dot_dimension_numbers<[1], [0], [0], [1], [0, 0, 1, 1], [], []>} : vector<40x32xf32>, vector<32x128xf32>, vector<40x128xf32> -> vector<40x128xf32>
    %17 = vector.broadcast %15 : vector<40x1xf32> to vector<40x128xf32>
    %18 = arith.addf %16, %17 : vector<40x128xf32>
    %c0_14 = arith.constant 0 : index
    %c0_15 = arith.constant 0 : index
    %19 = vector.load %arg7[%c0_14, %c0_15] : memref<32x40xf32, #tpu.memory_space<vmem>>, vector<32x40xf32>
    %c0_16 = arith.constant 0 : index
    %c0_17 = arith.constant 0 : index
    %20 = vector.load %arg8[%c0_16, %c0_17] : memref<32x1xf32, #tpu.memory_space<vmem>>, vector<32x1xf32>
    %cst_18 = arith.constant dense<0.000000e+00> : vector<32x128xf32>
    %21 = tpu.matmul %19, %18, %cst_18 {dimension_numbers = #tpu.dot_dimension_numbers<[1], [0], [0], [1], [0, 0, 1, 1], [], []>} : vector<32x40xf32>, vector<40x128xf32>, vector<32x128xf32> -> vector<32x128xf32>
    %22 = vector.broadcast %20 : vector<32x1xf32> to vector<32x128xf32>
    %23 = arith.addf %21, %22 : vector<32x128xf32>
    %cst_19 = arith.constant 0.000000e+00 : f32
    %24 = vector.broadcast %cst_19 : f32 to vector<32x128xf32>
    %25 = arith.maximumf %23, %24 : vector<32x128xf32>
    %c0_20 = arith.constant 0 : index
    %c0_21 = arith.constant 0 : index
    %26 = vector.load %arg9[%c0_20, %c0_21] : memref<1x32xf32, #tpu.memory_space<vmem>>, vector<1x32xf32>
    %c0_22 = arith.constant 0 : index
    %c0_23 = arith.constant 0 : index
    %27 = vector.load %arg10[%c0_22, %c0_23] : memref<1x1xf32, #tpu.memory_space<vmem>>, vector<1x1xf32>
    %cst_24 = arith.constant dense<0.000000e+00> : vector<1x128xf32>
    %28 = tpu.matmul %26, %25, %cst_24 {dimension_numbers = #tpu.dot_dimension_numbers<[1], [0], [0], [1], [0, 0, 1, 1], [], []>} : vector<1x32xf32>, vector<32x128xf32>, vector<1x128xf32> -> vector<1x128xf32>
    %29 = vector.broadcast %27 : vector<1x1xf32> to vector<1x128xf32>
    %30 = arith.addf %28, %29 : vector<1x128xf32>
    %31 = arith.negf %30 : vector<1x128xf32>
    %32 = math.exp %31 : vector<1x128xf32>
    %cst_25 = arith.constant 1.000000e+00 : f32
    %33 = vector.broadcast %cst_25 : f32 to vector<1x128xf32>
    %34 = arith.addf %33, %32 : vector<1x128xf32>
    %35 = arith.divf %33, %34 : vector<1x128xf32>
    %c0_26 = arith.constant 0 : index
    %c0_27 = arith.constant 0 : index
    %36 = vector.load %arg11[%c0_26, %c0_27] : memref<1x128xf32, #tpu.memory_space<vmem>>, vector<1x128xf32>
    tpu.vector_store %arg11[%c0_26, %c0_27], %35 {strides = array<i32>} : memref<1x128xf32, #tpu.memory_space<vmem>>, vector<1x128xf32>,
    return
  }
  func.func @transform_0(%arg0: i32) -> (i32, i32) {
    %c0_i32 = arith.constant 0 : i32
    %c0_i32_0 = arith.constant 0 : i32
    return %c0_i32, %arg0 : i32, i32
  }
  func.func @transform_1(%arg0: i32) -> (i32, i32) {
    %c0_i32 = arith.constant 0 : i32
    %c0_i32_0 = arith.constant 0 : i32
    %c0_i32_1 = arith.constant 0 : i32
    return %c0_i32, %c0_i32_0 : i32, i32
  }
  func.func @transform_2(%arg0: i32) -> (i32, i32) {
    %c0_i32 = arith.constant 0 : i32
    %c0_i32_0 = arith.constant 0 : i32
    %c0_i32_1 = arith.constant 0 : i32
    return %c0_i32, %c0_i32_0 : i32, i32
  }
  func.func @transform_3(%arg0: i32) -> (i32, i32) {
    %c0_i32 = arith.constant 0 : i32
    %c0_i32_0 = arith.constant 0 : i32
    %c0_i32_1 = arith.constant 0 : i32
    return %c0_i32, %c0_i32_0 : i32, i32
  }
  func.func @transform_4(%arg0: i32) -> (i32, i32) {
    %c0_i32 = arith.constant 0 : i32
    %c0_i32_0 = arith.constant 0 : i32
    %c0_i32_1 = arith.constant 0 : i32
    return %c0_i32, %c0_i32_0 : i32, i32
  }
  func.func @transform_5(%arg0: i32) -> (i32, i32) {
    %c0_i32 = arith.constant 0 : i32
    %c0_i32_0 = arith.constant 0 : i32
    %c0_i32_1 = arith.constant 0 : i32
    return %c0_i32, %c0_i32_0 : i32, i32
  }
  func.func @transform_6(%arg0: i32) -> (i32, i32) {
    %c0_i32 = arith.constant 0 : i32
    %c0_i32_0 = arith.constant 0 : i32
    %c0_i32_1 = arith.constant 0 : i32
    return %c0_i32, %c0_i32_0 : i32, i32
  }
  func.func @transform_7(%arg0: i32) -> (i32, i32) {
    %c0_i32 = arith.constant 0 : i32
    %c0_i32_0 = arith.constant 0 : i32
    %c0_i32_1 = arith.constant 0 : i32
    return %c0_i32, %c0_i32_0 : i32, i32
  }
  func.func @transform_8(%arg0: i32) -> (i32, i32) {
    %c0_i32 = arith.constant 0 : i32
    %c0_i32_0 = arith.constant 0 : i32
    %c0_i32_1 = arith.constant 0 : i32
    return %c0_i32, %c0_i32_0 : i32, i32
  }
  func.func @transform_9(%arg0: i32) -> (i32, i32) {
    %c0_i32 = arith.constant 0 : i32
    %c0_i32_0 = arith.constant 0 : i32
    %c0_i32_1 = arith.constant 0 : i32
    return %c0_i32, %c0_i32_0 : i32, i32
  }
  func.func @transform_10(%arg0: i32) -> (i32, i32) {
    %c0_i32 = arith.constant 0 : i32
    %c0_i32_0 = arith.constant 0 : i32
    return %c0_i32, %arg0 : i32, i32
  }
}

</mosaic_0001>

<bundles_post_ra>
// kernel: tpu_custom_call.1
= control target key start
LH: loop header
LB: loop body
LE: loop exit
PB: predicated region body
PF: predicated region fallthrough
CT: control target
= control target key end

     0   :  { %s605_s0 = inlined_call_operand.vmem [shape: f32[20,128], index: 0, kind: input, shape index: {}]   ;;  %s606_s1 = inlined_call_operand.vmem [shape: f32[32,20], index: 1, kind: input, shape index: {}]   ;;  %s607_s2 = inlined_call_operand.vmem [shape: f32[32,1], index: 2, kind: input, shape index: {}]   ;;  %s608_s3 = inlined_call_operand.vmem [shape: f32[32,1], index: 3, kind: input, shape index: {}]   ;;  %s609_s4 = inlined_call_operand.vmem [shape: f32[40,32], index: 4, kind: input, shape index: {}]   ;;  %s610_s5 = inlined_call_operand.vmem [shape: f32[40,1], index: 5, kind: input, shape index: {}]   ;;  %s611_s6 = inlined_call_operand.vmem [shape: f32[32,40], index: 6, kind: input, shape index: {}]   ;;  %s612_s7 = inlined_call_operand.vmem [shape: f32[32,1], index: 7, kind: input, shape index: {}]   ;;  %s613_s8 = inlined_call_operand.vmem [shape: f32[1,32], index: 8, kind: input, shape index: {}]   ;;  %s614_s9 = inlined_call_operand.<no memory space> [shape: f32[1,1], index: 9, kind: input, shape index: {}]   ;;  %s615_s10 = inlined_call_operand.hbm [shape: f32[1,128], index: 10, kind: output, shape index: {}]  }
   0x1   :  { %v15_v0 = vstv %s614_s9 }
   0x2   :  { %16 = vst [vmem:[#allocation2] sm:$0x1] %v15_v0 }
   0x3   :  { %v40_v1 = vld [vmem:[%s605_s0 + $0x10] sm:$0xf]  ;;  %vm82_vm0 = vcmask 1043456   ;;  %v48_v2 = vld [vmem:[%s607_s2 + $0x18] sm:$0xff]  ;;  %v430_v4 = vmov 0   ;;  %v39_v5 = vld [vmem:[%s605_s0 + $0x8] sm:$0xff] }
   0x4   :  { %v118_v3 = vld [vmem:[%s608_s3 + $0x18] sm:$0xff]  ;;  %397 = vset.pattern.permute.xlu0 %v430_v4  ;;  %375 = vmatpush.msk.msra.mxu0 %vm82_vm0, %v40_v1  ;;  %v38_v7 = vld [vmem:[%s605_s0] sm:$0xff]  ;;  %vm69_vm2 = vcmask 162816   ;;  %v117_v9 = vld [vmem:[%s608_s3 + $0x10] sm:$0xff] }
   0x5   :  { %vm122_vm1 = vcmp.gt.f32.partialorder %v118_v3, 0.0  ;;  %398 = vset.pattern.permute.xlu1 %v430_v4  ;;  %66 = vperm.xlu0 %397, %v48_v2   ;;  %v41_v8 = vld [vmem:[%s606_s1] sm:$0xff]  ;;  %vm121_vm3 = vcmp.gt.f32.partialorder %v117_v9, 0.0  ;;  %v47_v11 = vld [vmem:[%s607_s2 + $0x10] sm:$0xff] }
   0x6   :  { %v130_v6 = vsel %vm122_vm1, 1, %v430_v4  ;;  %100 = vmatpush.msra.mxu0 %v39_v5  ;;  %399 = vset.pattern.permute.xlu2 %v430_v4  ;;  %v129_v10 = vsel %vm121_vm3, 1, %v430_v4 }
   0x7   :  { %141 = vperm.xlu1 %398, %v130_v6   ;;  %138 = vperm.xlu2 %399, %v129_v10  }
   0x8   :  { %101 = vmatpush.msra.mxu0 %v38_v7 }
   0x9   :  { %376 = vmatmul.msk.f32.vlgmr.msra.gmra.mxu0 %vm69_vm2, %v41_v8 }
   0xa   :  { %17 = vsyncpa [#allocation4], 0  ;;  %v46_v12 = vld [vmem:[%s607_s2 + $0x8] sm:$0xff]  ;;  %v115_v14 = vld [vmem:[%s608_s3] sm:$0xff]  ;;  %vm186_vm10 = vcmask 261120   ;;  %vm262_vm11 = vcmask 326656  }
   0xb   :  { %v116_v13 = vld [vmem:[%s608_s3 + $0x8] sm:$0xff]  ;;  %v45_v16 = vld [vmem:[%s607_s2] sm:$0xff]  ;;  %vm119_vm5 = vcmp.gt.f32.partialorder %v115_v14, 0.0  ;;  %v43_v19 = vld [vmem:[%s606_s1 + $0x10] sm:$0xff]  ;;  %s366_s11 = sshll.u32 %s615_s10, 4  ;;  %s367_s11 = int_to_ptr.hbm [resolvable:$true] %s366_s11 }
   0xc   :  { %v42_v15 = vld [vmem:[%s606_s1 + $0x8] sm:$0xff]  ;;  %vm120_vm4 = vcmp.gt.f32.partialorder %v116_v13, 0.0  ;;  %v127_v18 = vsel %vm119_vm5, 1, %v430_v4  ;;  %v160_v20 = vld [vmem:[%s610_s5 + $0x20] sm:$0xff]  ;;  %v159_v21 = vld [vmem:[%s610_s5 + $0x18] sm:$0xff] }
   0xd   :  { %61 = vperm.xlu0 %397, %v47_v11   ;;  %v128_v17 = vsel %vm120_vm4, 1, %v430_v4  ;;  %v158_v22 = vld [vmem:[%s610_s5 + $0x10] sm:$0xff]  ;;  %v44_v23 = vld [vmem:[%s606_s1 + $0x18] sm:$0xff]  ;;  %v157_v24 = vld [vmem:[%s610_s5 + $0x8] sm:$0xff] }
   0xe   :  { %v156_v25 = vld [vmem:[%s610_s5] sm:$0xff]  ;;  %v241_v26 = vld [vmem:[%s612_s7 + $0x18] sm:$0xff]  ;;  %v240_v27 = vld [vmem:[%s612_s7 + $0x10] sm:$0xff] }
   0xf   :  { %56 = vperm.xlu1 %398, %v46_v12   ;;  %51 = vperm.xlu2 %399, %v45_v16   ;;  %v239_v28 = vld [vmem:[%s612_s7 + $0x8] sm:$0xff]  ;;  %v238_v29 = vld [vmem:[%s612_s7] sm:$0xff]  ;;  %v153_v58 = vld [vmem:[%s609_s4 + $0x10] sm:$0xff] }
  0x10   :  { %v309_v30 = vld [vmem:[#allocation2] sm:$0x1]  ;;  %v152_v57 = vld [vmem:[%s609_s4 + $0x8] sm:$0xff]  ;;  %v154_v59 = vld [vmem:[%s609_s4 + $0x18] sm:$0xff] }
  0x11   :  { %377 = vmatmul.msk.f32.gmra.mxu0 %vm69_vm2, %v42_v15  ;;  %v151_v54 = vld [vmem:[%s609_s4] sm:$0xff]  ;;  %v235_v12 = vld [vmem:[%s611_s6 + $0x8] sm:$0xff]  ;;  %v236_v13 = vld [vmem:[%s611_s6 + $0x10] sm:$0xff] }
  0x12   :  { %v155_v55 = vld [vmem:[%s609_s4 + $0x20] sm:$0xff]  ;;  %v237_v14 = vld [vmem:[%s611_s6 + $0x18] sm:$0xff] }
  0x13   :  { %v234_v11 = vld [vmem:[%s611_s6] sm:$0xff] }
  0x15   :  { %135 = vperm.xlu0 %397, %v128_v17  }
  0x17   :  { %132 = vperm.xlu1 %398, %v127_v18   ;;  %183 = vperm.xlu2 %399, %v160_v20  }
  0x19   :  { %378 = vmatmul.msk.f32.gmra.mxu0 %vm69_vm2, %v43_v19 }
  0x1d   :  { %178 = vperm.xlu0 %397, %v159_v21  }
  0x1f   :  { %173 = vperm.xlu1 %398, %v158_v22   ;;  %168 = vperm.xlu2 %399, %v157_v24  }
  0x21   :  { %379 = vmatmul.msk.f32.gmra.mxu0 %vm69_vm2, %v44_v23 }
  0x25   :  { %163 = vperm.xlu0 %397, %v156_v25  }
  0x27   :  { %259 = vperm.xlu1 %398, %v241_v26   ;;  %254 = vperm.xlu2 %399, %v240_v27  }
  0x2d   :  { %249 = vperm.xlu0 %397, %v239_v28  }
  0x2f   :  { %244 = vperm.xlu1 %398, %v238_v29   ;;  %312 = vperm.xlu2 %399, %v309_v30  }
  0x61   :  { %v139_v35 = vpop.permute.xlu2 %138 }
  0x62   :  { %vm145_vm6 = vcmp.eq.s32.totalorder %v139_v35, 1 }
  0x69   :  { %v52_v43 = vpop.permute.xlu2 %51 }
  0x71   :  { %v184_v61 = vpop.permute.xlu2 %183 }
  0x77   :  { %v67_v33 = vpop.permute.xlu0 %66 }
  0x79   :  { %v142_v34 = vpop.permute.xlu1 %141  ;;  %v169_v7 = vpop.permute.xlu2 %168 }
  0x7a   :  { %vm146_vm7 = vcmp.eq.s32.totalorder %v142_v34, 1 }
  0x7f   :  { %v62_v37 = vpop.permute.xlu0 %61 }
  0x81   :  { %v57_v38 = vpop.permute.xlu1 %56  ;;  %v255_v19 = vpop.permute.xlu2 %254 }
  0x86   :  { %v103_v31 = vpop.f32.mrf.mxu0 }
  0x87   :  { %v104_v44 = vadd.f32 %v103_v31, %v52_v43  ;;  %v136_v47 = vpop.permute.xlu0 %135  ;;  %v308_v31 = vld [vmem:[%s613_s8] sm:$0x1]  ;;  %s431_s8 = smov [#allocation3]  }
  0x88   :  { %vm144_vm8 = vcmp.eq.s32.totalorder %v136_v47, 1  ;;  %s364_s29 = sshll.u32 %s431_s8, 4  ;;  %s365_s29 = int_to_ptr.vmem [resolvable:$true] %s364_s29 }
  0x89   :  { %v133_v48 = vpop.permute.xlu1 %132  ;;  %v123_v51 = vmax.f32 %v104_v44, 0.0 }
  0x8a   :  { %vm143_vm9 = vcmp.eq.s32.totalorder %v133_v48, 1 }
  0x8b   :  { %v147_v56 = vsel %vm143_vm9, %v123_v51, %v104_v44 }
  0x8e   :  { %v106_v32 = vpop.f32.mrf.mxu0 }
  0x8f   :  { %v107_v41 = vadd.f32 %v106_v32, %v57_v38  ;;  %v179_v2 = vpop.permute.xlu0 %178  ;;  %v313_v32 = vpop.permute.xlu2 %312 }
  0x91   :  { %v124_v49 = vmax.f32 %v107_v41, 0.0  ;;  %v174_v5 = vpop.permute.xlu1 %173 }
  0x93   :  { %v148_v53 = vsel %vm144_vm8, %v124_v49, %v107_v41 }
  0x96   :  { %v109_v36 = vpop.f32.mrf.mxu0 }
  0x97   :  { %v110_v39 = vadd.f32 %v109_v36, %v62_v37  ;;  %v164_v9 = vpop.permute.xlu0 %163 }
  0x99   :  { %v125_v45 = vmax.f32 %v110_v39, 0.0  ;;  %v260_v18 = vpop.permute.xlu1 %259 }
  0x9b   :  { %v149_v52 = vsel %vm145_vm6, %v125_v45, %v110_v39 }
  0x9e   :  { %v112_v40 = vpop.f32.mrf.mxu0 }
  0x9f   :  { %v113_v42 = vadd.f32 %v112_v40, %v67_v33  ;;  %v250_v23 = vpop.permute.xlu0 %249  ;;  %v315_v33 = vperm.slane %v313_v32, 0 }
  0xa1   :  { %v126_v46 = vmax.f32 %v113_v42, 0.0  ;;  %v245_v26 = vpop.permute.xlu1 %244 }
  0xa3   :  { %v150_v50 = vsel %vm146_vm7, %v126_v46, %v113_v42 }
  0xa4   :  { %214 = vmatpush.msra.mxu1 %v150_v50  ;;  %391 = vmatpush.msra.mxu3 %v150_v50 }
  0xa6   :  { %215 = vmatpush.msra.mxu1 %v149_v52  ;;  %392 = vmatpush.msra.mxu3 %v149_v52 }
  0xa8   :  { %216 = vmatpush.msra.mxu1 %v148_v53  ;;  %393 = vmatpush.msra.mxu3 %v148_v53 }
  0xaa   :  { %217 = vmatpush.msra.mxu1 %v147_v56  ;;  %394 = vmatpush.msra.mxu3 %v147_v56 }
  0xab   :  { %380 = vmatmul.msk.f32.vlgmr.msra.gmra.mxu1 %vm186_vm10, %v151_v54  ;;  %384 = vmatmul.msk.f32.vlgmr.msra.gmra.mxu3 %vm186_vm10, %v155_v55 }
  0xb3   :  { %381 = vmatmul.msk.f32.gmra.mxu1 %vm186_vm10, %v152_v57 }
  0xbb   :  { %382 = vmatmul.msk.f32.gmra.mxu1 %vm186_vm10, %v153_v58 }
  0xc3   :  { %383 = vmatmul.msk.f32.gmra.mxu1 %vm186_vm10, %v154_v59 }
 0x128   :  { %v219_v60 = vpop.f32.mrf.mxu1 }
 0x129   :  { %v220_v10 = vadd.f32 %v219_v60, %v164_v9 }
 0x12e   :  { %v231_v62 = vpop.f32.mrf.mxu3 }
 0x12f   :  { %v232_v63 = vadd.f32 %v231_v62, %v184_v61 }
 0x130   :  { %v222_v0 = vpop.f32.mrf.mxu1 }
 0x131   :  { %286 = vmatpush.msra.mxu2 %v232_v63  ;;  %v223_v8 = vadd.f32 %v222_v0, %v169_v7 }
 0x138   :  { %v225_v1 = vpop.f32.mrf.mxu1 }
 0x139   :  { %v226_v6 = vadd.f32 %v225_v1, %v174_v5 }
 0x140   :  { %v228_v3 = vpop.f32.mrf.mxu1 }
 0x141   :  { %v229_v4 = vadd.f32 %v228_v3, %v179_v2 }
 0x143   :  { %287 = vmatpush.msra.mxu2 %v229_v4 }
 0x145   :  { %288 = vmatpush.msra.mxu2 %v226_v6 }
 0x147   :  { %289 = vmatpush.msra.mxu2 %v223_v8 }
 0x149   :  { %290 = vmatpush.msra.mxu2 %v220_v10 }
 0x14a   :  { %385 = vmatmul.msk.f32.vlgmr.msra.gmra.mxu2 %vm262_vm11, %v234_v11 }
 0x152   :  { %386 = vmatmul.msk.f32.gmra.mxu2 %vm262_vm11, %v235_v12 }
 0x15a   :  { %387 = vmatmul.msk.f32.gmra.mxu2 %vm262_vm11, %v236_v13 }
 0x162   :  { %388 = vmatmul.msk.f32.gmra.mxu2 %vm262_vm11, %v237_v14 }
 0x1cd   :  { %v292_v15 = vpop.f32.mrf.mxu2 }
 0x1ce   :  { %v293_v27 = vadd.f32 %v292_v15, %v245_v26 }
 0x1d0   :  { %v304_v30 = vmax.f32 %v293_v27, 0.0 }
 0x1d5   :  { %v295_v16 = vpop.f32.mrf.mxu2 }
 0x1d6   :  { %v296_v24 = vadd.f32 %v295_v16, %v250_v23 }
 0x1d8   :  { %v305_v29 = vmax.f32 %v296_v24, 0.0 }
 0x1dd   :  { %v298_v17 = vpop.f32.mrf.mxu2 }
 0x1de   :  { %v299_v21 = vadd.f32 %v298_v17, %v255_v19 }
 0x1e0   :  { %v306_v28 = vmax.f32 %v299_v21, 0.0 }
 0x1e5   :  { %v301_v20 = vpop.f32.mrf.mxu2 }
 0x1e6   :  { %v302_v22 = vadd.f32 %v301_v20, %v260_v18 }
 0x1e8   :  { %v307_v25 = vmax.f32 %v302_v22, 0.0 }
 0x1ea   :  { %331 = vmatpush.msrb.mxu3 %v307_v25 }
 0x1ec   :  { %332 = vmatpush.msrb.mxu3 %v306_v28 }
 0x1ee   :  { %333 = vmatpush.msrb.mxu3 %v305_v29 }
 0x1f0   :  { %334 = vmatpush.msrb.mxu3 %v304_v30 }
 0x1f1   :  { %389 = vmatmul.msk.f32.vlgmr.msrb.gmra.mxu3 %vm186_vm10, %v308_v31 }
 0x274   :  { %v336_v34 = vpop.f32.mrf.mxu3 }
 0x275   :  { %v337_v35 = vadd.f32 %v336_v34, %v315_v33 }
 0x277   :  { %v390_v36 = vmul.f32 -1.442695, %v337_v35 }
 0x279   :  { %400 = vpow2.f32 %v390_v36 }
 0x27f   :  { %v401_v37 = vpop.eup %400 }
 0x280   :  { %v342_v38 = vadd.f32 1.0, %v401_v37 }
 0x282   :  { %402 = vrcp.f32 %v342_v38  ;;  %v354_v42 = vand.u32 2147483648, %v342_v38  ;;  %v352_v44 = vand.u32 2147483647, %v342_v38  ;;  %vm348_vm13 = vweird.f32 %v342_v38 }
 0x284   :  { %v355_v46 = vor.u32 1.1754944e-38, %v354_v42  ;;  %vm353_vm15 = vcmp.eq.f32.partialorder %v352_v44, 8.507059e+37 }
 0x288   :  { %v403_v39 = vpop.eup %402 }
 0x289   :  { %v344_v40 = vmul.f32 %v403_v39, %v342_v38  ;;  %vm349_vm12 = vweird.f32 %v403_v39 }
 0x28a   :  { %vm350_vm14 = vmor %vm348_vm13, %vm349_vm12 }
 0x28b   :  { %v345_v41 = vsub.f32 1.0, %v344_v40 }
 0x28d   :  { %v346_v43 = vmul.f32 %v403_v39, %v345_v41 }
 0x28f   :  { %v347_v45 = vadd.f32 %v403_v39, %v346_v43 }
 0x291   :  { %v351_v47 = vsel %vm350_vm14, %v403_v39, %v347_v45 }
 0x292   :  { %v356_v48 = vsel %vm353_vm15, %v355_v46, %v351_v47 }
 0x293   :  { %358 = vst [vmem:[#allocation3] sm:$0x1] %v356_v48 }
 0x294   :  { %369 = dma.vmem_to_hbm [thread:$0]  %s365_s29, 16, %s367_s11, [#allocation4]  }
 0x295   :  { %428 = dma.done.wait [#allocation4], 16  }
 0x296   :  { %429 = vsyncadd [#allocation4], 4294967280 }
 0x297   :  { %374 = vsyncpa [#allocation4], 1 }

</bundles_post_ra>
